<compile_context>
chip_gen: v5e
topology: v5e:2x2
jax: 0.10.0
libtpu: 0.0.40
codegen_flags: <defaults>
</compile_context>

<pallas_src>
import jax
import jax.numpy as jnp
from jax.experimental import pallas as pl
from jax.experimental.pallas import tpu as pltpu


def _round_up(x, m):
    return ((x + m - 1) // m) * m


# ------------------------------ Pallas kernel ------------------------------ #

def _discriminator_kernel(z1_ref, z2_ref, w1a_ref, w1b_ref, b1_ref,
                          w2_ref, b2_ref, o_ref):
    # Fused: cat([z1, z2], 1) @ W1 + b1 -> ReLU -> @ W2 + b2 -> sigmoid.
    # First linear: bf16 operands, f32 MXU accumulation.
    h = (jnp.dot(z1_ref[...], w1a_ref[...], preferred_element_type=jnp.float32)
         + jnp.dot(z2_ref[...], w1b_ref[...], preferred_element_type=jnp.float32)
         + b1_ref[...])                                   # (bm, hidden) f32
    h = jnp.maximum(h, 0.0)

    # Second linear (N=1): VPU multiply + lane reduction instead of a
    # degenerate MXU matmul.  w2_ref is the weight row, shape (1, hidden).
    logit = jnp.sum(h * w2_ref[...], axis=-1, keepdims=True) + b2_ref[0]

    # Sigmoid: exp and reciprocal both on the EUP slot.
    o_ref[...] = pl.reciprocal(1.0 + jnp.exp(-logit), approx=True)


# --------------------------------- wrapper ---------------------------------- #

def discriminator_forward(z1, z2, params, *, block_m=1024):
    """z1, z2: (B, dim/2) each -> (B, 1) probabilities (== torch output)."""
    w1, b1, w2, b2 = params
    B, f1 = z1.shape
    _, f2 = z2.shape
    dim, hidden = w1.shape
    assert f1 + f2 == dim, (f1, f2, dim)

    # Fold the concat into the first matmul by splitting W1 row-wise; stream
    # activations and first-layer weights as bf16 (f32 accumulation on MXU).
    w1a = w1[:f1].astype(jnp.bfloat16)                    # (f1, hidden)
    w1b = w1[f1:].astype(jnp.bfloat16)                    # (f2, hidden)
    z1b = z1.astype(jnp.bfloat16)
    z2b = z2.astype(jnp.bfloat16)

    # Batch tile: big (HBM-bound kernel), sublane-aligned; ragged last block
    # is masked by Pallas — no wrapper-side padding copies.
    bm = min(block_m, _round_up(B, 8))
    grid = (pl.cdiv(B, bm),)

    out = pl.pallas_call(
        _discriminator_kernel,
        out_shape=jax.ShapeDtypeStruct((B, 1), jnp.float32),
        grid=grid,
        in_specs=[
            pl.BlockSpec((bm, f1), lambda i: (i, 0)),          # z1 tile (bf16)
            pl.BlockSpec((bm, f2), lambda i: (i, 0)),          # z2 tile (bf16)
            pl.BlockSpec((f1, hidden), lambda i: (0, 0)),      # W1a (resident)
            pl.BlockSpec((f2, hidden), lambda i: (0, 0)),      # W1b (resident)
            pl.BlockSpec((1, hidden), lambda i: (0, 0)),       # b1  (resident)
            pl.BlockSpec((1, hidden), lambda i: (0, 0)),       # W2 row (resident)
            pl.BlockSpec(memory_space=pltpu.MemorySpace.SMEM), # b2 scalar
        ],
        out_specs=pl.BlockSpec((bm, 1), lambda i: (i, 0)),
        compiler_params=pltpu.CompilerParams(
            dimension_semantics=("parallel",)),
    )(z1b, z2b, w1a, w1b,
      b1.reshape(1, hidden).astype(jnp.float32),
      w2.reshape(1, hidden).astype(jnp.float32),   # (hidden,1) -> row (1,hidden)
      b2.astype(jnp.float32))

    return out


# ----------------------------------- main ------------------------------------ #

if __name__ == "__main__":
    key = jax.random.PRNGKey(0)
    k_w1, k_b1, k_w2, k_b2, k_z1, k_z2 = jax.random.split(key, 6)

    DIM = 512                 # default `dim` of the torch module
    HIDDEN = DIM // 4         # 128
    B = 8                     # small batch

    # torch.nn.Linear-style init: U(-1/sqrt(fan_in), 1/sqrt(fan_in)).
    lim1 = 1.0 / (DIM ** 0.5)
    w1 = jax.random.uniform(k_w1, (DIM, HIDDEN), jnp.float32, -lim1, lim1)
    b1 = jax.random.uniform(k_b1, (HIDDEN,), jnp.float32, -lim1, lim1)
    lim2 = 1.0 / (HIDDEN ** 0.5)
    w2 = jax.random.uniform(k_w2, (HIDDEN, 1), jnp.float32, -lim2, lim2)
    b2 = jax.random.uniform(k_b2, (1,), jnp.float32, -lim2, lim2)
    params = (w1, b1, w2, b2)

    # z1, z2 each carry dim/2 features so that cat([z1, z2], 1) has `dim`.
    z1 = jax.random.normal(k_z1, (B, DIM // 2), jnp.float32)
    z2 = jax.random.normal(k_z2, (B, DIM // 2), jnp.float32)

    y = discriminator_forward(z1, z2, params)
    y = jax.block_until_ready(y)

    # Pure-JAX reference (same math as the torch module, full f32).
    z = jnp.concatenate([z1, z2], axis=1)
    h_ref = jnp.maximum(z @ w1 + b1, 0.0)
    y_ref = jax.nn.sigmoid(h_ref @ w2 + b2)

    assert y.shape == (B, 1), y.shape
    assert jnp.all(jnp.isfinite(y))
    # bf16 activation/weight stream => looser tolerance than pure f32.
    assert jnp.allclose(y, y_ref, atol=2e-2, rtol=2e-2), (
        float(jnp.max(jnp.abs(y - y_ref))))
    print("KERNEL_OK")
</pallas_src>

<mosaic_0001>
module attributes {stable_mosaic.version = 11 : i64} {
  func.func @_discriminator_kernel(%arg0: i32, %arg1: memref<8x256xbf16, #tpu.memory_space<vmem>>, %arg2: memref<8x256xbf16, #tpu.memory_space<vmem>>, %arg3: memref<256x128xbf16, #tpu.memory_space<vmem>>, %arg4: memref<256x128xbf16, #tpu.memory_space<vmem>>, %arg5: memref<1x128xf32, #tpu.memory_space<vmem>>, %arg6: memref<1x128xf32, #tpu.memory_space<vmem>>, %arg7: memref<1xf32, #tpu.memory_space<smem>>, %arg8: memref<8x1xf32, #tpu.memory_space<vmem>>) attributes {dimension_semantics = [#tpu.dimension_semantics<parallel>], iteration_bounds = array<i64: 1>, scalar_prefetch = 0 : i64, scratch_operands = 0 : i64, tpu.core_type = #tpu.core_type<tc>, window_params = [{transform_indices = @transform_0, window_bounds = array<i64: 8, 256>}, {transform_indices = @transform_1, window_bounds = array<i64: 8, 256>}, {pipeline_mode = #tpu.pipeline_mode<synchronous>, transform_indices = @transform_2, window_bounds = array<i64: 256, 128>}, {pipeline_mode = #tpu.pipeline_mode<synchronous>, transform_indices = @transform_3, window_bounds = array<i64: 256, 128>}, {pipeline_mode = #tpu.pipeline_mode<synchronous>, transform_indices = @transform_4, window_bounds = array<i64: 1, 128>}, {pipeline_mode = #tpu.pipeline_mode<synchronous>, transform_indices = @transform_5, window_bounds = array<i64: 1, 128>}, {transform_indices = @transform_6, window_bounds = array<i64: 1>}, {transform_indices = @transform_7, window_bounds = array<i64: 8, 1>}]} {
    %c0 = arith.constant 0 : index
    %c0_0 = arith.constant 0 : index
    %0 = vector.load %arg1[%c0, %c0_0] : memref<8x256xbf16, #tpu.memory_space<vmem>>, vector<8x256xbf16>
    %c0_1 = arith.constant 0 : index
    %c0_2 = arith.constant 0 : index
    %1 = vector.load %arg3[%c0_1, %c0_2] : memref<256x128xbf16, #tpu.memory_space<vmem>>, vector<256x128xbf16>
    %cst = arith.constant dense<0.000000e+00> : vector<8x128xf32>
    %2 = tpu.matmul %0, %1, %cst {dimension_numbers = #tpu.dot_dimension_numbers<[1], [0], [0], [1], [0, 0, 1, 1], [], []>} : vector<8x256xbf16>, vector<256x128xbf16>, vector<8x128xf32> -> vector<8x128xf32>
    %c0_3 = arith.constant 0 : index
    %c0_4 = arith.constant 0 : index
    %3 = vector.load %arg2[%c0_3, %c0_4] : memref<8x256xbf16, #tpu.memory_space<vmem>>, vector<8x256xbf16>
    %c0_5 = arith.constant 0 : index
    %c0_6 = arith.constant 0 : index
    %4 = vector.load %arg4[%c0_5, %c0_6] : memref<256x128xbf16, #tpu.memory_space<vmem>>, vector<256x128xbf16>
    %cst_7 = arith.constant dense<0.000000e+00> : vector<8x128xf32>
    %5 = tpu.matmul %3, %4, %cst_7 {dimension_numbers = #tpu.dot_dimension_numbers<[1], [0], [0], [1], [0, 0, 1, 1], [], []>} : vector<8x256xbf16>, vector<256x128xbf16>, vector<8x128xf32> -> vector<8x128xf32>
    %6 = arith.addf %2, %5 : vector<8x128xf32>
    %c0_8 = arith.constant 0 : index
    %c0_9 = arith.constant 0 : index
    %7 = vector.load %arg5[%c0_8, %c0_9] : memref<1x128xf32, #tpu.memory_space<vmem>>, vector<1x128xf32>
    %8 = vector.broadcast %7 : vector<1x128xf32> to vector<8x128xf32>
    %9 = arith.addf %6, %8 : vector<8x128xf32>
    %cst_10 = arith.constant 0.000000e+00 : f32
    %10 = vector.broadcast %cst_10 : f32 to vector<8x128xf32>
    %11 = arith.maximumf %9, %10 : vector<8x128xf32>
    %c0_11 = arith.constant 0 : index
    %c0_12 = arith.constant 0 : index
    %12 = vector.load %arg6[%c0_11, %c0_12] : memref<1x128xf32, #tpu.memory_space<vmem>>, vector<1x128xf32>
    %13 = vector.broadcast %12 : vector<1x128xf32> to vector<8x128xf32>
    %14 = arith.mulf %11, %13 : vector<8x128xf32>
    %cst_13 = arith.constant dense<0.000000e+00> : vector<8xf32>
    %15 = vector.multi_reduction <add>, %14, %cst_13 [1] : vector<8x128xf32> to vector<8xf32>
    %16 = vector.shape_cast %15 : vector<8xf32> to vector<8x1xf32>
    %c0_14 = arith.constant 0 : index
    %17 = memref.load %arg7[%c0_14] : memref<1xf32, #tpu.memory_space<smem>>
    %18 = vector.broadcast %17 : f32 to vector<8x1xf32>
    %19 = arith.addf %16, %18 : vector<8x1xf32>
    %cst_15 = arith.constant 0.000000e+00 : f32
    %20 = vector.broadcast %cst_15 : f32 to vector<8x1xf32>
    %21 = arith.subf %20, %19 : vector<8x1xf32>
    %22 = math.exp %21 : vector<8x1xf32>
    %cst_16 = arith.constant 1.000000e+00 : f32
    %23 = vector.broadcast %cst_16 : f32 to vector<8x1xf32>
    %24 = arith.addf %23, %22 : vector<8x1xf32>
    %25 = tpu.reciprocal %24 {approx = true} : vector<8x1xf32> -> vector<8x1xf32>
    %c0_17 = arith.constant 0 : index
    %c0_18 = arith.constant 0 : index
    %26 = vector.load %arg8[%c0_17, %c0_18] : memref<8x1xf32, #tpu.memory_space<vmem>>, vector<8x1xf32>
    tpu.vector_store %arg8[%c0_17, %c0_18], %25 {strides = array<i32>} : memref<8x1xf32, #tpu.memory_space<vmem>>, vector<8x1xf32>,
    return
  }
  func.func @transform_0(%arg0: i32) -> (i32, i32) {
    %c0_i32 = arith.constant 0 : i32
    %c0_i32_0 = arith.constant 0 : i32
    return %arg0, %c0_i32 : i32, i32
  }
  func.func @transform_1(%arg0: i32) -> (i32, i32) {
    %c0_i32 = arith.constant 0 : i32
    %c0_i32_0 = arith.constant 0 : i32
    return %arg0, %c0_i32 : i32, i32
  }
  func.func @transform_2(%arg0: i32) -> (i32, i32) {
    %c0_i32 = arith.constant 0 : i32
    %c0_i32_0 = arith.constant 0 : i32
    %c0_i32_1 = arith.constant 0 : i32
    return %c0_i32, %c0_i32_0 : i32, i32
  }
  func.func @transform_3(%arg0: i32) -> (i32, i32) {
    %c0_i32 = arith.constant 0 : i32
    %c0_i32_0 = arith.constant 0 : i32
    %c0_i32_1 = arith.constant 0 : i32
    return %c0_i32, %c0_i32_0 : i32, i32
  }
  func.func @transform_4(%arg0: i32) -> (i32, i32) {
    %c0_i32 = arith.constant 0 : i32
    %c0_i32_0 = arith.constant 0 : i32
    %c0_i32_1 = arith.constant 0 : i32
    return %c0_i32, %c0_i32_0 : i32, i32
  }
  func.func @transform_5(%arg0: i32) -> (i32, i32) {
    %c0_i32 = arith.constant 0 : i32
    %c0_i32_0 = arith.constant 0 : i32
    %c0_i32_1 = arith.constant 0 : i32
    return %c0_i32, %c0_i32_0 : i32, i32
  }
  func.func @transform_6(%arg0: i32) -> i32 {
    %c0_i32 = arith.constant 0 : i32
    %c0_i32_0 = arith.constant 0 : i32
    return %c0_i32 : i32
  }
  func.func @transform_7(%arg0: i32) -> (i32, i32) {
    %c0_i32 = arith.constant 0 : i32
    %c0_i32_0 = arith.constant 0 : i32
    return %arg0, %c0_i32 : i32, i32
  }
}

</mosaic_0001>

<bundles_post_ra>
// kernel: tpu_custom_call.1
= control target key start
LH: loop header
LB: loop body
LE: loop exit
PB: predicated region body
PF: predicated region fallthrough
CT: control target
= control target key end

     0   :  { %13 = vsyncpa [#allocation4], 0  ;;  %s784_s0 = inlined_call_operand.hbm [shape: bf16[8,256], index: 0, kind: input, shape index: {}]   ;;  %s785_s1 = inlined_call_operand.hbm [shape: bf16[8,256], index: 1, kind: input, shape index: {}]   ;;  %s786_s2 = inlined_call_operand.hbm [shape: bf16[256,128], index: 2, kind: input, shape index: {}]   ;;  %s787_s3 = inlined_call_operand.hbm [shape: bf16[256,128], index: 3, kind: input, shape index: {}]   ;;  %s788_s4 = inlined_call_operand.vmem [shape: f32[1,128], index: 4, kind: input, shape index: {}]   ;;  %s789_s5 = inlined_call_operand.vmem [shape: f32[1,128], index: 5, kind: input, shape index: {}]   ;;  %s790_s6 = inlined_call_operand.<no memory space> [shape: f32[1], index: 6, kind: input, shape index: {}]   ;;  %s791_s7 = inlined_call_operand.vmem [shape: f32[8,1], index: 7, kind: output, shape index: {}]  }
   0x1   :  { %14 = vsyncpa [#allocation6], 0  ;;  %s32_s26 = sshll.u32 %s785_s1, 4  ;;  %s33_s26 = int_to_ptr.hbm [resolvable:$true] %s32_s26 }
   0x2   :  { %15 = vsyncpa [#allocation9], 0  ;;  %s714_s27 = smov [#allocation5]   ;;  %s21_s8 = sshll.u32 %s784_s0, 4  ;;  %s22_s8 = int_to_ptr.hbm [resolvable:$true] %s21_s8 }
   0x3   :  { %s34_s28 = sshll.u32 %s714_s27, 4  ;;  %s715_s9 = smov [#allocation3]   ;;  %s35_s28 = int_to_ptr.vmem [resolvable:$true] %s34_s28 }
   0x4   :  { %37 = dma.hbm_to_vmem [thread:$0]  %s33_s26, 128, %s35_s28, [#allocation6]  }
   0x5   :  { %s23_s10 = sshll.u32 %s715_s9, 4  ;;  %s42_s13 = sshll.u32 %s786_s2, 4  ;;  %s24_s10 = int_to_ptr.vmem [resolvable:$true] %s23_s10  ;;  %s43_s13 = int_to_ptr.hbm [resolvable:$true] %s42_s13 }
   0x6   :  { %26 = dma.hbm_to_vmem [thread:$0]  %s22_s8, 128, %s24_s10, [#allocation4]  }
   0x7   :  { %s716_s1 = smov [#allocation7]   ;;  %s55_s17 = sshll.u32 %s787_s3, 4  ;;  %s56_s17 = int_to_ptr.hbm [resolvable:$true] %s55_s17 }
   0x8   :  { %s44_s14 = sshll.u32 %s716_s1, 4  ;;  %s717_s18 = smov 64   ;;  %s45_s14 = int_to_ptr.vmem [resolvable:$true] %s44_s14 }
   0x9   :  { %s718_s0 = smov 4   ;;  %s719_s19 = smov [#allocation8]  }
   0xa   :  { %50 = dma.hbm_to_vmem [thread:$0]  %s43_s13, 2048, %s45_s14, [#allocation6], %s717_s18, %s717_s18, %s718_s0  }
   0xb   :  { %s57_s20 = sshll.u32 %s719_s19, 4  ;;  %s58_s20 = int_to_ptr.vmem [resolvable:$true] %s57_s20 }
   0xc   :  { %63 = dma.hbm_to_vmem [thread:$0]  %s56_s17, 2048, %s58_s20, [#allocation9], %s717_s18, %s717_s18, %s718_s0  }
   0xd   :  { %708 = dma.done.wait [#allocation4], 128  }
   0xe   :  { %709 = vsyncadd [#allocation4], 4294967168 }
   0xf   :  { %710 = dma.done.wait [#allocation6], 2176  }
  0x10   :  { %711 = vsyncadd [#allocation6], 4294965120 }
  0x11   :  { %712 = dma.done.wait [#allocation9], 2048  }
  0x12   :  { %713 = vsyncadd [#allocation9], 4294965248  ;;  %v591_v0 = vld [vmem:[#allocation8 + $0x38] sm:$0xff]  ;;  %v590_v4 = vld [vmem:[#allocation8 + $0x30] sm:$0xff]  ;;  %v424_v58 = vstv %s790_s6  ;;  %vm431_vm0 = vcmask 7168  }
  0x13   :  { %v599_v1 = vld [vmem:[#allocation8 + $0x78] sm:$0xff]  ;;  %255 = vmatpush.bf16.msra.mxu0 %v591_v0  ;;  %v598_v5 = vld [vmem:[#allocation8 + $0x70] sm:$0xff]  ;;  %v589_v8 = vld [vmem:[#allocation8 + $0x28] sm:$0xff] }
  0x14   :  { %v575_v2 = vld [vmem:[#allocation7 + $0x38] sm:$0xff]  ;;  %268 = vmatpush.bf16.msra.mxu1 %v599_v1  ;;  %v574_v6 = vld [vmem:[#allocation7 + $0x30] sm:$0xff]  ;;  %v597_v9 = vld [vmem:[#allocation8 + $0x68] sm:$0xff] }
  0x15   :  { %v583_v3 = vld [vmem:[#allocation7 + $0x78] sm:$0xff]  ;;  %384 = vmatpush.bf16.msra.mxu2 %v575_v2  ;;  %v582_v7 = vld [vmem:[#allocation7 + $0x70] sm:$0xff]  ;;  %v573_v10 = vld [vmem:[#allocation7 + $0x28] sm:$0xff] }
  0x16   :  { %397 = vmatpush.bf16.msra.mxu3 %v583_v3  ;;  %v581_v11 = vld [vmem:[#allocation7 + $0x68] sm:$0xff]  ;;  %v588_v12 = vld [vmem:[#allocation8 + $0x20] sm:$0xff]  ;;  %v587_v16 = vld [vmem:[#allocation8 + $0x18] sm:$0xff] }
  0x17   :  { %256 = vmatpush.bf16.msra.mxu0 %v590_v4  ;;  %v596_v13 = vld [vmem:[#allocation8 + $0x60] sm:$0xff]  ;;  %v595_v17 = vld [vmem:[#allocation8 + $0x58] sm:$0xff]  ;;  %v586_v20 = vld [vmem:[#allocation8 + $0x10] sm:$0xff] }
  0x18   :  { %269 = vmatpush.bf16.msra.mxu1 %v598_v5  ;;  %v572_v14 = vld [vmem:[#allocation7 + $0x20] sm:$0xff]  ;;  %v571_v18 = vld [vmem:[#allocation7 + $0x18] sm:$0xff]  ;;  %v594_v21 = vld [vmem:[#allocation8 + $0x50] sm:$0xff] }
  0x19   :  { %385 = vmatpush.bf16.msra.mxu2 %v574_v6  ;;  %v580_v15 = vld [vmem:[#allocation7 + $0x60] sm:$0xff]  ;;  %v579_v19 = vld [vmem:[#allocation7 + $0x58] sm:$0xff]  ;;  %v570_v22 = vld [vmem:[#allocation7 + $0x10] sm:$0xff] }
  0x1a   :  { %398 = vmatpush.bf16.msra.mxu3 %v582_v7  ;;  %v578_v23 = vld [vmem:[#allocation7 + $0x50] sm:$0xff]  ;;  %v585_v24 = vld [vmem:[#allocation8 + $0x8] sm:$0xff]  ;;  %v119_v26 = vld [vmem:[#allocation5] sm:$0xff] }
  0x1b   :  { %257 = vmatpush.bf16.msra.mxu0 %v589_v8  ;;  %v593_v25 = vld [vmem:[#allocation8 + $0x48] sm:$0xff]  ;;  %v86_v29 = vld [vmem:[#allocation3] sm:$0xff]  ;;  %v153_v30 = vunpack.c.l.b16 %v119_v26  ;;  %v154_v31 = vunpack.c.h.b16 %v119_v26  ;;  %v584_v32 = vld [vmem:[#allocation8] sm:$0xff] }
  0x1c   :  { %270 = vmatpush.bf16.msra.mxu1 %v597_v9  ;;  %v569_v27 = vld [vmem:[#allocation7 + $0x8] sm:$0xff]  ;;  %v592_v33 = vld [vmem:[#allocation8 + $0x40] sm:$0xff]  ;;  %v282_v34 = vunpack.c.l.b16 %v86_v29  ;;  %v283_v35 = vunpack.c.h.b16 %v86_v29  ;;  %v606_v50 = vld [vmem:[%s788_s4] ss:$0 sm:$0xff] }
  0x1d   :  { %386 = vmatpush.bf16.msra.mxu2 %v573_v10  ;;  %v577_v28 = vld [vmem:[#allocation7 + $0x48] sm:$0xff]  ;;  %v568_v36 = vld [vmem:[#allocation7] sm:$0xff]  ;;  %v155_v38 = vpack.c.b16 %v153_v30, %v153_v30  ;;  %v156_v39 = vpack.c.b16 %v154_v31, %v154_v31  ;;  %v607_v53 = vld [vmem:[%s789_s5] ss:$0 sm:$0xff] }
  0x1e   :  { %399 = vmatpush.bf16.msra.mxu3 %v581_v11  ;;  %v576_v37 = vld [vmem:[#allocation7 + $0x40] sm:$0xff]  ;;  %v284_v40 = vpack.c.b16 %v282_v34, %v282_v34  ;;  %v285_v41 = vpack.c.b16 %v283_v35, %v283_v35 }
  0x1f   :  { %258 = vmatpush.bf16.msra.mxu0 %v588_v12 }
  0x20   :  { %271 = vmatpush.bf16.msra.mxu1 %v596_v13 }
  0x21   :  { %387 = vmatpush.bf16.msra.mxu2 %v572_v14 }
  0x22   :  { %400 = vmatpush.bf16.msra.mxu3 %v580_v15 }
  0x23   :  { %259 = vmatpush.bf16.msra.mxu0 %v587_v16 }
  0x24   :  { %272 = vmatpush.bf16.msra.mxu1 %v595_v17 }
  0x25   :  { %388 = vmatpush.bf16.msra.mxu2 %v571_v18 }
  0x26   :  { %401 = vmatpush.bf16.msra.mxu3 %v579_v19 }
  0x27   :  { %260 = vmatpush.bf16.msra.mxu0 %v586_v20 }
  0x28   :  { %273 = vmatpush.bf16.msra.mxu1 %v594_v21 }
  0x29   :  { %389 = vmatpush.bf16.msra.mxu2 %v570_v22 }
  0x2a   :  { %402 = vmatpush.bf16.msra.mxu3 %v578_v23 }
  0x2b   :  { %261 = vmatpush.bf16.msra.mxu0 %v585_v24 }
  0x2c   :  { %274 = vmatpush.bf16.msra.mxu1 %v593_v25 }
  0x2d   :  { %390 = vmatpush.bf16.msra.mxu2 %v569_v27 }
  0x2e   :  { %403 = vmatpush.bf16.msra.mxu3 %v577_v28 }
  0x2f   :  { %262 = vmatpush.bf16.msra.mxu0 %v584_v32 }
  0x30   :  { %275 = vmatpush.bf16.msra.mxu1 %v592_v33 }
  0x31   :  { %391 = vmatpush.bf16.msra.mxu2 %v568_v36 }
  0x32   :  { %404 = vmatpush.bf16.msra.mxu3 %v576_v37  ;;  %263 = vmatmul.bf16.vlgmr.msra.gmra.mxu0 %v155_v38 }
  0x33   :  { %276 = vmatmul.bf16.vlgmr.msra.gmra.mxu1 %v156_v39 }
  0x34   :  { %392 = vmatmul.bf16.vlgmr.msra.gmra.mxu2 %v284_v40 }
  0x35   :  { %405 = vmatmul.bf16.vlgmr.msra.gmra.mxu3 %v285_v41 }
  0xaf   :  { %v264_v42 = vpop.f32.mrf.mxu0 }
  0xb0   :  { %v277_v43 = vpop.f32.mrf.mxu1 }
  0xb1   :  { %v278_v44 = vadd.f32 %v277_v43, %v264_v42 }
  0xb7   :  { %v393_v45 = vpop.f32.mrf.mxu2  ;;  %v266_v48 = vpop.f32.mrf.mxu0 }
  0xb8   :  { %v406_v46 = vpop.f32.mrf.mxu3  ;;  %v394_v47 = vadd.f32 %v393_v45, %v278_v44  ;;  %v279_v49 = vpop.f32.mrf.mxu1 }
  0xba   :  { %v407_v51 = vadd.f32 %v406_v46, %v394_v47 }
  0xbc   :  { %v414_v52 = vadd.f32 %v606_v50, %v407_v51 }
  0xbe   :  { %v415_v54 = vmax.f32 %v414_v52, 0.0 }
  0xbf   :  { %v395_v55 = vpop.f32.mrf.mxu2 }
  0xc0   :  { %v408_v56 = vpop.f32.mrf.mxu3  ;;  %v420_v57 = vmul.f32 %v607_v53, %v415_v54 }
  0xc2   :  { %421 = vadd.xlane.f32.xlu0 %v420_v57 }
 0x135   :  { %v422_v59 = vpop.xlane.xlu0 %421 }
 0x136   :  { %v425_v60 = vadd.f32 %v424_v58, %v422_v59 }
 0x138   :  { %v426_v61 = vsub.f32 0.0, %v425_v60 }
 0x13a   :  { %v427_v62 = vmul.f32 1.442695, %v426_v61 }
 0x13c   :  { %608 = vpow2.f32 %v427_v62 }
 0x142   :  { %v609_v63 = vpop.eup %608 }
 0x143   :  { %v429_v0 = vadd.f32 1.0, %v609_v63 }
 0x145   :  { %610 = vrcp.f32 %v429_v0 }
 0x14b   :  { %v611_v1 = vpop.eup %610 }
 0x14c   :  { %432 = vst.msk [vmem:[%s791_s7] sm:$0xff] %vm431_vm0, %v611_v1 }
 0x14d   :  { %437 = vsyncpa [#allocation4], 1 }
 0x14e   :  { %438 = vsyncpa [#allocation6], 1 }
 0x14f   :  { %439 = vsyncpa [#allocation9], 1 }

</bundles_post_ra>
